<compile_context>
chip_gen: v7x
topology: tpu7x:2x2x1
jax: 0.10.0
libtpu: 0.0.40
codegen_flags: <defaults>
</compile_context>

<pallas_src>
import functools

import jax
import jax.numpy as jnp
from jax.experimental import pallas as pl
from jax.experimental.pallas import tpu as pltpu


def _round_up(x: int, m: int) -> int:
    return ((x + m - 1) // m) * m


def _sublane(dtype) -> int:
    # Sublane packing: 8 rows for 32-bit, 16 for 16-bit, 32 for 8-bit dtypes.
    return max(8, 32 // jnp.dtype(dtype).itemsize)


def _vmem_capacity_bytes() -> int:
    try:
        return int(pltpu.get_tpu_info().vmem_capacity_bytes)
    except Exception:
        return 64 << 20  # conservative fallback = v7x per-TensorCore VMEM


def _pad_to(a, target_shape):
    pads = [(0, t - s) for s, t in zip(a.shape, target_shape)]
    if all(p == (0, 0) for p in pads):
        return a
    return jnp.pad(a, pads)


def _pick_batch_tile(batch: int, block_batch: int, sub: int) -> int:
    """Sublane-aligned batch tile; >=2 tiles when batch>64; prefer exact divisors."""
    if batch <= 64:
        return _round_up(max(batch, 1), sub)
    hi = min(block_batch, _round_up(pl.cdiv(batch, 2), sub))
    hi = max((hi // sub) * sub, sub)
    cand = hi
    # Only accept divisors not much smaller than `hi` (avoid tiny tiles / grid overhead).
    while cand >= max(sub, (2 * hi) // 3):
        if batch % cand == 0:
            return cand            # divides batch exactly -> no pad, no output slice
        cand -= sub
    return hi


def _mlp_kernel(x_ref, w1_ref, b1_ref, w2_ref, b2_ref, o_ref, acc_ref):
    k = pl.program_id(1)           # hidden-dim tile index (reduction axis, innermost)

    @pl.when(k == 0)
    def _():
        acc_ref[...] = jnp.zeros_like(acc_ref)

    # fc1 (this hid tile): (tm, In) @ (In, tH), f32 accumulation on the MXU.
    h = jnp.dot(x_ref[...], w1_ref[...], preferred_element_type=jnp.float32)
    # bias + ReLU in f32 on the VPU (b1 kept f32; works on v5e's f32-only VPU).
    h = jnp.maximum(h + b1_ref[...], 0.0)
    if w2_ref.dtype != h.dtype:    # bf16 path: feed the MXU native bf16
        h = h.astype(w2_ref.dtype)
    # fc2 partial: (tm, tH) @ (tH, Out), accumulated in f32 VMEM scratch.
    acc_ref[...] += jnp.dot(h, w2_ref[...], preferred_element_type=jnp.float32)

    @pl.when(k == pl.num_programs(1) - 1)
    def _():
        o_ref[...] = (acc_ref[...] + b2_ref[...]).astype(o_ref.dtype)


@functools.partial(jax.jit, static_argnames=("block_batch", "block_hidden", "compute_dtype"))
def simple_nn_forward(x, w1, b1, w2, b2, *, block_batch=512, block_hidden=None,
                      compute_dtype=None):
    """fc1 -> relu -> fc2 forward pass: relu(x @ W1 + b1) @ W2 + b2.

    x : (batch, input_size)
    w1: (input_size, hidden_size), b1: (1, hidden_size)
    w2: (hidden_size, output_size), b2: (1, output_size)
    compute_dtype: e.g. jnp.bfloat16 to run x/W on the bf16 MXU path (f32 accumulation).
    """
    batch, in_size = x.shape
    hid_size = w1.shape[1]
    out_size = w2.shape[1]
    out_dtype = x.dtype

    # Optional reduced-precision compute path (cast once, outside the kernel).
    if compute_dtype is not None and jnp.dtype(compute_dtype) != jnp.dtype(x.dtype):
        x = x.astype(compute_dtype)
        w1 = w1.astype(compute_dtype)
        w2 = w2.astype(compute_dtype)
    b1 = b1.astype(jnp.float32)
    b2 = b2.astype(jnp.float32)

    x_item = jnp.dtype(x.dtype).itemsize
    w_item = jnp.dtype(w1.dtype).itemsize
    o_item = jnp.dtype(out_dtype).itemsize

    # Lane-dense padding of feature dims (MXU alignment / unmasked stores).
    in_p = _round_up(in_size, 128)
    out_p = _round_up(out_size, 128)
    hid_128 = _round_up(hid_size, 128)

    cap = _vmem_capacity_bytes()

    # Hidden-dim tiling: stream W1/W2 by hid tile (accumulator kernel) when resident
    # weights would eat more than ~60% of this generation's VMEM (v7x: 64 MiB).
    resident_w_bytes = (in_p * hid_128 + hid_128 * out_p) * w_item
    if block_hidden is not None:
        tile_hid = min(_round_up(block_hidden, 128), hid_128)
    elif resident_w_bytes > int(0.6 * cap):
        tile_hid = min(512, hid_128)   # 256-multiple keeps v6e/v7x 256-wide MXUs full
    else:
        tile_hid = hid_128             # weights stay fully VMEM-resident
    hid_p = _round_up(hid_size, tile_hid)
    hid_tiles = hid_p // tile_hid

    # Batch tiling (sublane packing of the compute dtype; >=2 tiles for v7x megacore).
    sub = max(_sublane(x.dtype), _sublane(out_dtype))
    tm = _pick_batch_tile(batch, block_batch, sub)
    batch_p = _round_up(batch, tm)
    grid = (batch_p // tm, hid_tiles)

    # Zero-padding is semantics-preserving: padded input cols / hidden units see zero
    # weights and zero bias -> relu(0) = 0 -> contribute nothing; padded output cols
    # and batch rows are sliced off at the end (only if padding actually happened).
    x_p = _pad_to(x, (batch_p, in_p))
    w1_p = _pad_to(w1, (in_p, hid_p))
    b1_p = _pad_to(b1, (1, hid_p))
    w2_p = _pad_to(w2, (hid_p, out_p))
    b2_p = _pad_to(b2, (1, out_p))

    # VMEM budget: generation-aware, real dtype itemsizes, ~15% headroom below capacity.
    w_bufs = 1 if hid_tiles == 1 else 2  # invariant weights are single-buffered
    vmem_est = (
        2 * tm * in_p * x_item                                     # x tile (double-buffered)
        + 2 * tm * out_p * o_item                                  # out tile (double-buffered)
        + w_bufs * (in_p * tile_hid + tile_hid * out_p) * w_item   # w1 / w2 tiles
        + w_bufs * tile_hid * 4 + out_p * 4                        # b1 / b2 (f32)
        + tm * out_p * 4                                           # f32 accumulator scratch
        + tm * tile_hid * 4                                        # f32 hidden intermediate
    )
    vmem_limit = min(max(int(vmem_est * 1.5) + (4 << 20), 16 << 20), int(cap * 0.85))
    # TODO(synk): if in_p/out_p alone blow the budget (huge feature dims), also tile the
    # input/output feature dims instead of relying on hid-tiling alone.

    cost = pl.CostEstimate(
        flops=2 * batch_p * (in_p * hid_p + hid_p * out_p),
        transcendentals=0,
        bytes_accessed=(x_p.size * x_item + (w1_p.size + w2_p.size) * w_item
                        + (b1_p.size + b2_p.size) * 4 + batch_p * out_p * o_item),
    )

    def _spec(shape, index_map, invariant):
        if invariant:  # grid-invariant operand: single buffer, no wasted VMEM
            return pl.BlockSpec(shape, index_map, pipeline_mode=pl.Buffered(1))
        return pl.BlockSpec(shape, index_map)

    weights_invariant = hid_tiles == 1

    out_arr = pl.pallas_call(
        _mlp_kernel,
        out_shape=jax.ShapeDtypeStruct((batch_p, out_p), out_dtype),
        grid=grid,
        in_specs=[
            pl.BlockSpec((tm, in_p), lambda i, k: (i, 0)),                    # x: per batch tile
            _spec((in_p, tile_hid), lambda i, k: (0, k), weights_invariant),  # w1
            _spec((1, tile_hid), lambda i, k: (0, k), weights_invariant),     # b1
            _spec((tile_hid, out_p), lambda i, k: (k, 0), weights_invariant), # w2
            _spec((1, out_p), lambda i, k: (0, 0), True),                     # b2: invariant
        ],
        out_specs=pl.BlockSpec((tm, out_p), lambda i, k: (i, 0)),
        scratch_shapes=[pltpu.VMEM((tm, out_p), jnp.float32)],
        compiler_params=pltpu.CompilerParams(
            dimension_semantics=("parallel", "arbitrary"),  # batch tiles megacore-sharded
            vmem_limit_bytes=vmem_limit,
        ),
        cost_estimate=cost,
    )(x_p, w1_p, b1_p, w2_p, b2_p)

    if batch_p != batch or out_p != out_size:
        out_arr = out_arr[:batch, :out_size]
    return out_arr


def init_params(key, input_size, hidden_size, output_size, dtype=jnp.float32):
    """Deterministic parameter init (uniform, like PyTorch's default Linear init)."""
    k1, k2, k3, k4 = jax.random.split(key, 4)
    bound1 = 1.0 / (input_size ** 0.5)
    bound2 = 1.0 / (hidden_size ** 0.5)
    # stored as (in, out) so the kernel does x @ W
    w1 = jax.random.uniform(k1, (input_size, hidden_size), dtype, -bound1, bound1)
    b1 = jax.random.uniform(k2, (1, hidden_size), dtype, -bound1, bound1)
    w2 = jax.random.uniform(k3, (hidden_size, output_size), dtype, -bound2, bound2)
    b2 = jax.random.uniform(k4, (1, output_size), dtype, -bound2, bound2)
    return w1, b1, w2, b2


if __name__ == "__main__":
    key = jax.random.PRNGKey(0)
    batch, input_size, hidden_size, output_size = 8, 32, 64, 16

    kx, kp = jax.random.split(key)
    x = jax.random.normal(kx, (batch, input_size), jnp.float32)
    w1, b1, w2, b2 = init_params(kp, input_size, hidden_size, output_size)
    ref = jnp.maximum(x @ w1 + b1, 0.0) @ w2 + b2

    # 1) default f32 path (weights fully VMEM-resident, single hid tile)
    out = simple_nn_forward(x, w1, b1, w2, b2)
    jax.block_until_ready(out)
    assert out.shape == (batch, output_size)
    assert jnp.allclose(out, ref, atol=1e-5, rtol=1e-5)

    # 2) bf16 weight/activation path (native-bf16 MXU, f32 accumulation)
    out_bf16 = simple_nn_forward(x, w1, b1, w2, b2, compute_dtype=jnp.bfloat16)
    jax.block_until_ready(out_bf16)
    assert jnp.allclose(out_bf16, ref, atol=5e-2, rtol=5e-2)

    # 3) hid-tiled accumulator path (what v7x uses when weights exceed its 64 MiB VMEM)
    w1b, b1b, w2b, b2b = init_params(jax.random.PRNGKey(1), input_size, 320, output_size)
    out_tiled = simple_nn_forward(x, w1b, b1b, w2b, b2b, block_hidden=128)
    jax.block_until_ready(out_tiled)
    ref_tiled = jnp.maximum(x @ w1b + b1b, 0.0) @ w2b + b2b
    assert jnp.allclose(out_tiled, ref_tiled, atol=1e-4, rtol=1e-4)

    print("KERNEL_OK")
</pallas_src>

<mosaic_0001>
module attributes {stable_mosaic.version = 11 : i64} {
  func.func @_mlp_kernel(%arg0: i32, %arg1: i32, %arg2: memref<8x128xf32, #tpu.memory_space<vmem>>, %arg3: memref<128x128xf32, #tpu.memory_space<vmem>>, %arg4: memref<1x128xf32, #tpu.memory_space<vmem>>, %arg5: memref<128x128xf32, #tpu.memory_space<vmem>>, %arg6: memref<1x128xf32, #tpu.memory_space<vmem>>, %arg7: memref<8x128xf32, #tpu.memory_space<vmem>>, %arg8: memref<8x128xf32, #tpu.memory_space<vmem>>) attributes {dimension_semantics = [#tpu.dimension_semantics<parallel>, #tpu.dimension_semantics<arbitrary>], iteration_bounds = array<i64: 1, 1>, scalar_prefetch = 0 : i64, scratch_operands = 1 : i64, tpu.core_type = #tpu.core_type<tc>, window_params = [{transform_indices = @transform_0, window_bounds = array<i64: 8, 128>}, {pipeline_mode = #tpu.pipeline_mode<synchronous>, transform_indices = @transform_1, window_bounds = array<i64: 128, 128>}, {pipeline_mode = #tpu.pipeline_mode<synchronous>, transform_indices = @transform_2, window_bounds = array<i64: 1, 128>}, {pipeline_mode = #tpu.pipeline_mode<synchronous>, transform_indices = @transform_3, window_bounds = array<i64: 128, 128>}, {pipeline_mode = #tpu.pipeline_mode<synchronous>, transform_indices = @transform_4, window_bounds = array<i64: 1, 128>}, {transform_indices = @transform_5, window_bounds = array<i64: 8, 128>}]} {
    %c0_i32 = arith.constant 0 : i32
    %0 = arith.cmpi eq, %arg1, %c0_i32 : i32
    %1 = arith.extui %0 : i1 to i32
    %c0_i32_0 = arith.constant 0 : i32
    %2 = arith.cmpi ne, %1, %c0_i32_0 : i32
    scf.if %2 {
      %cst_16 = arith.constant 0.000000e+00 : f32
      %19 = vector.broadcast %cst_16 : f32 to vector<8x128xf32>
      %c0_17 = arith.constant 0 : index
      %c0_18 = arith.constant 0 : index
      %20 = vector.load %arg8[%c0_17, %c0_18] : memref<8x128xf32, #tpu.memory_space<vmem>>, vector<8x128xf32>
      tpu.vector_store %arg8[%c0_17, %c0_18], %19 {strides = array<i32>} : memref<8x128xf32, #tpu.memory_space<vmem>>, vector<8x128xf32>,
    } else {
    }
    %c0 = arith.constant 0 : index
    %c0_1 = arith.constant 0 : index
    %3 = vector.load %arg2[%c0, %c0_1] : memref<8x128xf32, #tpu.memory_space<vmem>>, vector<8x128xf32>
    %c0_2 = arith.constant 0 : index
    %c0_3 = arith.constant 0 : index
    %4 = vector.load %arg3[%c0_2, %c0_3] : memref<128x128xf32, #tpu.memory_space<vmem>>, vector<128x128xf32>
    %cst = arith.constant dense<0.000000e+00> : vector<8x128xf32>
    %5 = tpu.matmul %3, %4, %cst {dimension_numbers = #tpu.dot_dimension_numbers<[1], [0], [0], [1], [0, 0, 1, 1], [], []>} : vector<8x128xf32>, vector<128x128xf32>, vector<8x128xf32> -> vector<8x128xf32>
    %c0_4 = arith.constant 0 : index
    %c0_5 = arith.constant 0 : index
    %6 = vector.load %arg4[%c0_4, %c0_5] : memref<1x128xf32, #tpu.memory_space<vmem>>, vector<1x128xf32>
    %7 = vector.broadcast %6 : vector<1x128xf32> to vector<8x128xf32>
    %8 = arith.addf %5, %7 : vector<8x128xf32>
    %cst_6 = arith.constant 0.000000e+00 : f32
    %9 = vector.broadcast %cst_6 : f32 to vector<8x128xf32>
    %10 = arith.maximumf %8, %9 : vector<8x128xf32>
    %c0_7 = arith.constant 0 : index
    %c0_8 = arith.constant 0 : index
    %11 = vector.load %arg8[%c0_7, %c0_8] : memref<8x128xf32, #tpu.memory_space<vmem>>, vector<8x128xf32>
    %c0_9 = arith.constant 0 : index
    %c0_10 = arith.constant 0 : index
    %12 = vector.load %arg5[%c0_9, %c0_10] : memref<128x128xf32, #tpu.memory_space<vmem>>, vector<128x128xf32>
    %cst_11 = arith.constant dense<0.000000e+00> : vector<8x128xf32>
    %13 = tpu.matmul %10, %12, %cst_11 {dimension_numbers = #tpu.dot_dimension_numbers<[1], [0], [0], [1], [0, 0, 1, 1], [], []>} : vector<8x128xf32>, vector<128x128xf32>, vector<8x128xf32> -> vector<8x128xf32>
    %14 = arith.addf %11, %13 : vector<8x128xf32>
    %c0_12 = arith.constant 0 : index
    %c0_13 = arith.constant 0 : index
    %15 = vector.load %arg8[%c0_12, %c0_13] : memref<8x128xf32, #tpu.memory_space<vmem>>, vector<8x128xf32>
    tpu.vector_store %arg8[%c0_12, %c0_13], %14 {strides = array<i32>} : memref<8x128xf32, #tpu.memory_space<vmem>>, vector<8x128xf32>,
    %c0_i32_14 = arith.constant 0 : i32
    %16 = arith.cmpi eq, %arg1, %c0_i32_14 : i32
    %17 = arith.extui %16 : i1 to i32
    %c0_i32_15 = arith.constant 0 : i32
    %18 = arith.cmpi ne, %17, %c0_i32_15 : i32
    scf.if %18 {
      %c0_16 = arith.constant 0 : index
      %c0_17 = arith.constant 0 : index
      %19 = vector.load %arg8[%c0_16, %c0_17] : memref<8x128xf32, #tpu.memory_space<vmem>>, vector<8x128xf32>
      %c0_18 = arith.constant 0 : index
      %c0_19 = arith.constant 0 : index
      %20 = vector.load %arg6[%c0_18, %c0_19] : memref<1x128xf32, #tpu.memory_space<vmem>>, vector<1x128xf32>
      %21 = vector.broadcast %20 : vector<1x128xf32> to vector<8x128xf32>
      %22 = arith.addf %19, %21 : vector<8x128xf32>
      %c0_20 = arith.constant 0 : index
      %c0_21 = arith.constant 0 : index
      %23 = vector.load %arg7[%c0_20, %c0_21] : memref<8x128xf32, #tpu.memory_space<vmem>>, vector<8x128xf32>
      tpu.vector_store %arg7[%c0_20, %c0_21], %22 {strides = array<i32>} : memref<8x128xf32, #tpu.memory_space<vmem>>, vector<8x128xf32>,
    } else {
    }
    return
  }
  func.func @transform_0(%arg0: i32, %arg1: i32) -> (i32, i32) {
    %c0_i32 = arith.constant 0 : i32
    %c0_i32_0 = arith.constant 0 : i32
    return %arg0, %c0_i32 : i32, i32
  }
  func.func @transform_1(%arg0: i32, %arg1: i32) -> (i32, i32) {
    %c0_i32 = arith.constant 0 : i32
    %c0_i32_0 = arith.constant 0 : i32
    return %c0_i32, %arg1 : i32, i32
  }
  func.func @transform_2(%arg0: i32, %arg1: i32) -> (i32, i32) {
    %c0_i32 = arith.constant 0 : i32
    %c0_i32_0 = arith.constant 0 : i32
    return %c0_i32, %arg1 : i32, i32
  }
  func.func @transform_3(%arg0: i32, %arg1: i32) -> (i32, i32) {
    %c0_i32 = arith.constant 0 : i32
    %c0_i32_0 = arith.constant 0 : i32
    return %arg1, %c0_i32 : i32, i32
  }
  func.func @transform_4(%arg0: i32, %arg1: i32) -> (i32, i32) {
    %c0_i32 = arith.constant 0 : i32
    %c0_i32_0 = arith.constant 0 : i32
    %c0_i32_1 = arith.constant 0 : i32
    return %c0_i32, %c0_i32_0 : i32, i32
  }
  func.func @transform_5(%arg0: i32, %arg1: i32) -> (i32, i32) {
    %c0_i32 = arith.constant 0 : i32
    %c0_i32_0 = arith.constant 0 : i32
    return %arg0, %c0_i32 : i32, i32
  }
}

</mosaic_0001>

<bundles_post_ra>
// kernel: simple_nn_forward.1
= control target key start
LH: loop header
LB: loop body
LE: loop exit
PB: predicated region body
PF: predicated region fallthrough
CT: control target
= control target key end

     0   :  { %v419_v3 = vmov 0.0|0.0   ;;  %vm420_vm0 = vmmov 0   ;;  %v421_v6 = vmov 0.0   ;;  %s586_s0 = inlined_call_operand.vmem [shape: f32[8,128], index: 0, kind: input, shape index: {}]   ;;  %s587_s1 = inlined_call_operand.vmem [shape: f32[128,128], index: 1, kind: input, shape index: {}]   ;;  %s588_s2 = inlined_call_operand.vmem [shape: f32[1,128], index: 2, kind: input, shape index: {}]   ;;  %s589_s3 = inlined_call_operand.vmem [shape: f32[128,128], index: 3, kind: input, shape index: {}]   ;;  %s590_s4 = inlined_call_operand.vmem [shape: f32[1,128], index: 4, kind: input, shape index: {}]   ;;  %s591_s5 = inlined_call_operand.hbm [shape: f32[8,128], index: 5, kind: output, shape index: {}]  }
   0x1   :  { %v27_v0 = vld [vmem:[%s587_s1] sm:$0xff]  ;;  %v28_v1 = vld [vmem:[%s587_s1 + $0x8] sm:$0xff]  ;;  %v29_v2 = vld [vmem:[%s587_s1 + $0x10] sm:$0xff]  ;;  %343 = vmatprep.subr.bf16.mxu0 %v419_v3  ;;  %305 = vmatprep.mubr.msk.f32.mxu0 %vm420_vm0, %v421_v6 }
   0x2   :  { %v344_v4 = vpack.c.bf16 %v28_v1, %v27_v0  ;;  %v30_v5 = vld [vmem:[%s587_s1 + $0x18] sm:$0xff]  ;;  %367 = vmatprep.subr.bf16.mxu1 %v419_v3  ;;  %340 = vmatprep.mubr.msk.f32.mxu1 %vm420_vm0, %v421_v6  ;;  %v31_v8 = vld [vmem:[%s587_s1 + $0x20] sm:$0xff]  ;;  %v32_v9 = vld [vmem:[%s587_s1 + $0x28] sm:$0xff] }
   0x3   :  { %v347_v7 = vpack.c.bf16 %v30_v5, %v29_v2  ;;  %v122_v10 = vld [vmem:[%s589_s3] sm:$0xff]  ;;  %v123_v11 = vld [vmem:[%s589_s3 + $0x8] sm:$0xff]  ;;  %v124_v12 = vld [vmem:[%s589_s3 + $0x10] sm:$0xff]  ;;  %v350_v14 = vpack.c.bf16 %v32_v9, %v31_v8 }
   0x4   :  { %345 = vmatpush3.bf16.msra.mxu0 %v344_v4  ;;  %v125_v13 = vld [vmem:[%s589_s3 + $0x18] sm:$0xff]  ;;  %v368_v15 = vpack.c.bf16 %v123_v11, %v122_v10  ;;  %v33_v16 = vld [vmem:[%s587_s1 + $0x30] sm:$0xff]  ;;  %v126_v19 = vld [vmem:[%s589_s3 + $0x20] sm:$0xff] }
   0x5   :  { %346 = vmatprep.subr.bf16.mxu0 %v419_v3  ;;  %v34_v17 = vld [vmem:[%s587_s1 + $0x38] sm:$0xff]  ;;  %v371_v18 = vpack.c.bf16 %v125_v13, %v124_v12  ;;  %v127_v20 = vld [vmem:[%s589_s3 + $0x28] sm:$0xff] }
   0x6   :  { %369 = vmatpush3.bf16.msra.mxu1 %v368_v15 }
   0x7   :  { %370 = vmatprep.subr.bf16.mxu1 %v419_v3 }
   0x8   :  { %348 = vmatpush3.bf16.msra.mxu0 %v347_v7 }
   0x9   :  { %349 = vmatprep.subr.bf16.mxu0 %v419_v3 }
   0xa   :  { %10 = vsyncpa [#allocation4], 0  ;;  %v353_v21 = vpack.c.bf16 %v34_v17, %v33_v16  ;;  %v35_v22 = vld [vmem:[%s587_s1 + $0x40] sm:$0xff]  ;;  %v36_v23 = vld [vmem:[%s587_s1 + $0x48] sm:$0xff]  ;;  %372 = vmatpush3.bf16.msra.mxu1 %v371_v18  ;;  %v374_v24 = vpack.c.bf16 %v127_v20, %v126_v19  ;;  %s422_s11 = smov [#allocation3]  }
   0xb   :  { %373 = vmatprep.subr.bf16.mxu1 %v419_v3  ;;  %v128_v25 = vld [vmem:[%s589_s3 + $0x30] sm:$0xff]  ;;  %v129_v26 = vld [vmem:[%s589_s3 + $0x38] sm:$0xff]  ;;  %v356_v27 = vpack.c.bf16 %v36_v23, %v35_v22  ;;  %v130_v31 = vld [vmem:[%s589_s3 + $0x40] sm:$0xff]  ;;  %s229_s12 = sshll.u32 %s422_s11, 4  ;;  %s230_s12 = int_to_ptr.vmem [resolvable:$true] %s229_s12 }
   0xc   :  { %351 = vmatpush3.bf16.msra.mxu0 %v350_v14  ;;  %v37_v28 = vld [vmem:[%s587_s1 + $0x50] sm:$0xff]  ;;  %v38_v29 = vld [vmem:[%s587_s1 + $0x58] sm:$0xff]  ;;  %v377_v30 = vpack.c.bf16 %v129_v26, %v128_v25  ;;  %v131_v32 = vld [vmem:[%s589_s3 + $0x48] sm:$0xff]  ;;  %p400_p1 = scmp.lt.s32.totalorder %s230_s12, %s230_s12 }
   0xd   :  { %352 = vmatprep.subr.bf16.mxu0 %v419_v3  ;;  %v359_v33 = vpack.c.bf16 %v38_v29, %v37_v28  ;;  %v39_v34 = vld [vmem:[%s587_s1 + $0x60] sm:$0xff]  ;;  %v40_v35 = vld [vmem:[%s587_s1 + $0x68] sm:$0xff]  ;;  %v380_v36 = vpack.c.bf16 %v131_v32, %v130_v31  ;;  %v132_v37 = vld [vmem:[%s589_s3 + $0x50] sm:$0xff] }
   0xe   :  { %375 = vmatpush3.bf16.msra.mxu1 %v374_v24  ;;  %v133_v38 = vld [vmem:[%s589_s3 + $0x58] sm:$0xff]  ;;  %v362_v39 = vpack.c.bf16 %v40_v35, %v39_v34  ;;  %v41_v40 = vld [vmem:[%s587_s1 + $0x70] sm:$0xff]  ;;  %v134_v43 = vld [vmem:[%s589_s3 + $0x60] sm:$0xff] }
   0xf   :  { %376 = vmatprep.subr.bf16.mxu1 %v419_v3  ;;  %v42_v41 = vld [vmem:[%s587_s1 + $0x78] sm:$0xff]  ;;  %v383_v42 = vpack.c.bf16 %v133_v38, %v132_v37  ;;  %v135_v44 = vld [vmem:[%s589_s3 + $0x68] sm:$0xff]  ;;  %v26_v47 = vld [vmem:[%s586_s0] sm:$0xff] }
  0x10   :  { %354 = vmatpush3.bf16.msra.mxu0 %v353_v21  ;;  %v365_v45 = vpack.c.bf16 %v42_v41, %v41_v40  ;;  %v386_v46 = vpack.c.bf16 %v135_v44, %v134_v43  ;;  %v136_v48 = vld [vmem:[%s589_s3 + $0x70] sm:$0xff]  ;;  %v137_v49 = vld [vmem:[%s589_s3 + $0x78] sm:$0xff]  ;;  %v237_v51 = vld [vmem:[%s588_s2] ss:$0 sm:$0xff]  ;;  %s395_s3 = scalar_lea.vmem %s230_s12, 128 }
  0x11   :  { %355 = vmatprep.subr.bf16.mxu0 %v419_v3  ;;  %v389_v50 = vpack.c.bf16 %v137_v49, %v136_v48  ;;  %v238_v56 = vld [vmem:[%s590_s4] ss:$0 sm:$0xff]  ;;  %p396_p0 = scmp.ne.s32.totalorder %s230_s12, %s395_s3  ;;  %p401_p2 = scmp.lt.s32.totalorder %s395_s3, %s395_s3 }
  0x12   :  { %378 = vmatpush3.bf16.msra.mxu1 %v377_v30 }
  0x13   :  { %379 = vmatprep.subr.bf16.mxu1 %v419_v3  ;;  %p402_p3 = por %p401_p2, %p400_p1 }
  0x14   :  { %357 = vmatpush3.bf16.msra.mxu0 %v356_v27 }
  0x15   :  { %358 = vmatprep.subr.bf16.mxu0 %v419_v3  ;;  %p403_p4 = pnand %p402_p3, %p396_p0 }
  0x16   :  { %381 = vmatpush3.bf16.msra.mxu1 %v380_v36 }
  0x17   :  { %382 = vmatprep.subr.bf16.mxu1 %v419_v3 }
  0x18   :  { %360 = vmatpush3.bf16.msra.mxu0 %v359_v33 }
  0x19   :  { %361 = vmatprep.subr.bf16.mxu0 %v419_v3 }
  0x1a   :  { %384 = vmatpush3.bf16.msra.mxu1 %v383_v42 }
  0x1b   :  { %385 = vmatprep.subr.bf16.mxu1 %v419_v3 }
  0x1c   :  { %363 = vmatpush3.bf16.msra.mxu0 %v362_v39 }
  0x1d   :  { %364 = vmatprep.subr.bf16.mxu0 %v419_v3 }
  0x1e   :  { %387 = vmatpush3.bf16.msra.mxu1 %v386_v46 }
  0x1f   :  { %388 = vmatprep.subr.bf16.mxu1 %v419_v3 }
  0x20   :  { %366 = vmatpush3.bf16.msra.mxu0 %v365_v45 }
  0x22   :  { %390 = vmatpush3.bf16.msra.mxu1 %v389_v50 }
  0x23   :  { %306 = vmatmul.mubr.f32.vlgmr.msra.gmra.mrb[0].mxu0 %v26_v47 }
  0xf6   :  { %v116_v52 = vpop.f32.mrb[0].mxu0 }
  0xf7   :  { %v117_v53 = vadd.f32 %v237_v51, %v116_v52  ;;  %v307_v54 = vpop.f32.mrb[1].mxu0 }
  0xf9   :  { %v120_v55 = vmax.f32 %v117_v53, 0.0 }
  0xfb   :  { %341 = vmatmul.mubr.f32.vlgmr.msra.gmra.mrb[0].mxu1 %v120_v55 }
 0x1ce   :  { %v204_v57 = vpop.f32.mrb[0].mxu1 }
 0x1cf   :  { %v221_v58 = vadd.f32 %v238_v56, %v204_v57  ;;  %v342_v59 = vpop.f32.mrb[1].mxu1 }
 0x1d1   :  { %222 = vst [vmem:[#allocation3] sm:$0xff] %v221_v58 }
 0x1d2   :  { %406 = shalt.err (!%p403_p4)
}
 0x1d3   :  { %s407_s14 = scalar_lea.hbm %s591_s5, 128 }
 0x1d4   :  { %p408_p5 = scmp.ne.s32.totalorder %s591_s5, %s407_s14  ;;  %p411_p6 = scmp.lt.u32.totalorder %s407_s14, %s591_s5 }
 0x1d6   :  { %p413_p7 = pnand %p411_p6, %p408_p5 }
 0x1d8   :  { %416 = shalt.err (!%p413_p7)
}
 0x1d9   :  { %232 = dma.vmem_to_hbm [thread:$0]  %s230_s12, 128, %s591_s5, [#allocation4]  }
 0x1da   :  { %417 = dma.done.wait [#allocation4], 128  }
 0x1db   :  { %418 = vsyncadd [#allocation4], 4294967168 }
 0x1dc   :  { %236 = vsyncpa [#allocation4], 1 }

</bundles_post_ra>
